<compile_context>
chip_gen: v7x
topology: tpu7x:2x2x1
jax: 0.10.0
libtpu: 0.0.40
codegen_flags: <defaults>
</compile_context>

<pallas_src>
import functools

import jax
import jax.numpy as jnp
from jax import lax
from jax.experimental import pallas as pl
from jax.experimental.pallas import tpu as pltpu


def _gru_step(gi, h, w_hh, gh_bias):
    """One GRU step with precomputed input gates.

    gi:      (B, 3H) input gates  x @ W_ih_fused + b_ih   (gate order r|z|n)
    h:       (B, H)  previous hidden state
    w_hh:    (H, 3H) fused hidden-to-hidden weights
    gh_bias: (B, 3H) pre-broadcast hidden bias b_hh
    """
    H = h.shape[-1]
    gh = jnp.dot(h, w_hh, preferred_element_type=jnp.float32) + gh_bias
    r = jax.nn.sigmoid(gi[:, 0:H] + gh[:, 0:H])
    z = jax.nn.sigmoid(gi[:, H:2 * H] + gh[:, H:2 * H])
    n = jnp.tanh(gi[:, 2 * H:3 * H] + r * gh[:, 2 * H:3 * H])
    return (1.0 - z) * n + z * h


def seq2seq_kernel(S,                                   # static seq length
                   x_ref,                               # (S*Bp, Din) time-major
                   e_wih, e_whh, e_bih, e_bhh,          # encoder: (Din,3H) (H,3H) (1,3H) (1,3H)
                   d_wih, d_whh, d_bih, d_bhh,          # decoder: (H,3H)  (H,3H) (1,3H) (1,3H)
                   out_w, out_b,                        # output Linear: (H,Op) (1,Op)
                   o_ref):                              # (Bp, Op)
    SB, _ = x_ref.shape
    Bp = SB // S
    H = e_whh.shape[0]

    # Hoist loop-invariant loads / broadcasts out of the recurrence.
    e_whh_v = e_whh[...]
    e_bhh_b = jnp.broadcast_to(e_bhh[...], (Bp, 3 * H))

    # All encoder input-to-hidden gates in one MXU pass: (S*Bp, 3H).
    gi_all = (jnp.dot(x_ref[...], e_wih[...],
                      preferred_element_type=jnp.float32) + e_bih[...])

    # Encoder recurrence, fully unrolled (S is small and static).
    h = jnp.zeros((Bp, H), jnp.float32)
    enc_out0 = None
    for t in range(S):
        gi_t = gi_all[t * Bp:(t + 1) * Bp, :]
        h = _gru_step(gi_t, h, e_whh_v, e_bhh_b)
        if t == 0:
            enc_out0 = jnp.maximum(h, 0.0)       # relu(encoder output at t=0)

    # Decoder: first time step only (reference consumes dec_out[:, 0, :]).
    d_bhh_b = jnp.broadcast_to(d_bhh[...], (Bp, 3 * H))
    gi_dec = (jnp.dot(enc_out0, d_wih[...],
                      preferred_element_type=jnp.float32) + d_bih[...])
    dec_h = _gru_step(gi_dec, h, d_whh[...], d_bhh_b)   # hidden = enc_hT (no relu)

    logits = jnp.dot(dec_h, out_w[...],
                     preferred_element_type=jnp.float32) + out_b[...]
    o_ref[...] = jnp.maximum(logits, 0.0)


def seq2seq_forward(x, params):
    """x: (B, S, input_dim) float32 -> (B, output_dim) float32."""
    B, S, Din = x.shape
    H = params["enc_w_hh"].shape[1]
    O = params["out_w"].shape[0]

    Bp = max(8, -(-B // 8) * 8)     # pad batch to full sublane tile
    Op = -(-O // 128) * 128         # lane-dense output store

    # Fuse the 3 gate matrices: PyTorch (3H, in) -> (in, 3H), gate order r|z|n.
    f32 = jnp.float32
    e_wih = params["enc_w_ih"].T.astype(f32)            # (Din, 3H)
    e_whh = params["enc_w_hh"].T.astype(f32)            # (H, 3H)
    e_bih = params["enc_b_ih"].astype(f32).reshape(1, 3 * H)
    e_bhh = params["enc_b_hh"].astype(f32).reshape(1, 3 * H)
    d_wih = params["dec_w_ih"].T.astype(f32)            # (H, 3H)
    d_whh = params["dec_w_hh"].T.astype(f32)            # (H, 3H)
    d_bih = params["dec_b_ih"].astype(f32).reshape(1, 3 * H)
    d_bhh = params["dec_b_hh"].astype(f32).reshape(1, 3 * H)

    out_w = jnp.zeros((H, Op), f32).at[:, :O].set(params["out_w"].T.astype(f32))
    out_b = jnp.zeros((1, Op), f32).at[:, :O].set(params["out_b"].astype(f32).reshape(1, O))

    # Time-major, batch-padded, flattened input: (S*Bp, Din).
    x_pad = jnp.zeros((Bp, S, Din), f32).at[:B].set(x.astype(f32))
    x_flat = jnp.transpose(x_pad, (1, 0, 2)).reshape(S * Bp, Din)

    vmem = pl.BlockSpec(memory_space=pltpu.MemorySpace.VMEM)
    kernel = functools.partial(seq2seq_kernel, S)
    y = pl.pallas_call(
        kernel,
        out_shape=jax.ShapeDtypeStruct((Bp, Op), jnp.float32),
        in_specs=[vmem] * 11,
        out_specs=vmem,
    )(x_flat, e_wih, e_whh, e_bih, e_bhh, d_wih, d_whh, d_bih, d_bhh, out_w, out_b)
    return y[:B, :O]


def _init_params(key, input_dim, hidden, output_dim):
    """Deterministic PyTorch-style uniform(-1/sqrt(H), 1/sqrt(H)) init."""
    k = 1.0 / jnp.sqrt(jnp.float32(hidden))
    keys = jax.random.split(key, 10)

    def u(kk, shape):
        return jax.random.uniform(kk, shape, jnp.float32, -k, k)

    return {
        "enc_w_ih": u(keys[0], (3 * hidden, input_dim)),
        "enc_w_hh": u(keys[1], (3 * hidden, hidden)),
        "enc_b_ih": u(keys[2], (3 * hidden,)),
        "enc_b_hh": u(keys[3], (3 * hidden,)),
        "dec_w_ih": u(keys[4], (3 * hidden, hidden)),
        "dec_w_hh": u(keys[5], (3 * hidden, hidden)),
        "dec_b_ih": u(keys[6], (3 * hidden,)),
        "dec_b_hh": u(keys[7], (3 * hidden,)),
        "out_w":    u(keys[8], (output_dim, hidden)),
        "out_b":    u(keys[9], (output_dim,)),
    }


def _reference_forward(x, params):
    """Pure-JAX replica of the PyTorch forward, for verification."""
    B, S, Din = x.shape
    H = params["enc_w_hh"].shape[1]

    def gru_seq(xs, h, w_ih, w_hh, b_ih, b_hh):
        def cell(h, x_t):
            gi = x_t @ w_ih.T + b_ih
            gh = h @ w_hh.T + b_hh
            i_r, i_z, i_n = jnp.split(gi, 3, axis=-1)
            h_r, h_z, h_n = jnp.split(gh, 3, axis=-1)
            r = jax.nn.sigmoid(i_r + h_r)
            z = jax.nn.sigmoid(i_z + h_z)
            n = jnp.tanh(i_n + r * h_n)
            h_new = (1.0 - z) * n + z * h
            return h_new, h_new
        h_final, outs = lax.scan(cell, h, jnp.transpose(xs, (1, 0, 2)))
        return jnp.transpose(outs, (1, 0, 2)), h_final

    h0 = jnp.zeros((B, H), jnp.float32)
    enc_out, enc_hT = gru_seq(x, h0, params["enc_w_ih"], params["enc_w_hh"],
                              params["enc_b_ih"], params["enc_b_hh"])
    enc_out = jax.nn.relu(enc_out)
    dec_out, _ = gru_seq(enc_out, enc_hT, params["dec_w_ih"], params["dec_w_hh"],
                         params["dec_b_ih"], params["dec_b_hh"])
    y = dec_out[:, 0, :] @ params["out_w"].T + params["out_b"]
    return jax.nn.relu(y)


if __name__ == "__main__":
    # Small shapes consistent with the module's forward.
    batch, seq_len, input_dim, hidden, output_dim = 2, 8, 4, 32, 4

    key = jax.random.PRNGKey(0)
    k_x, k_p = jax.random.split(key)
    x = jax.random.normal(k_x, (batch, seq_len, input_dim), jnp.float32)
    params = _init_params(k_p, input_dim, hidden, output_dim)

    y = jax.block_until_ready(seq2seq_forward(x, params))
    y_ref = jax.block_until_ready(_reference_forward(x, params))

    assert y.shape == (batch, output_dim)
    assert jnp.allclose(y, y_ref, atol=1e-5, rtol=1e-5), (y, y_ref)

    print("KERNEL_OK")
</pallas_src>

<mosaic_0001>
module attributes {stable_mosaic.version = 11 : i64} {
  func.func @seq2seq_kernel(%arg0: memref<64x4xf32, #tpu.memory_space<vmem>>, %arg1: memref<4x96xf32, #tpu.memory_space<vmem>>, %arg2: memref<32x96xf32, #tpu.memory_space<vmem>>, %arg3: memref<1x96xf32, #tpu.memory_space<vmem>>, %arg4: memref<1x96xf32, #tpu.memory_space<vmem>>, %arg5: memref<32x96xf32, #tpu.memory_space<vmem>>, %arg6: memref<32x96xf32, #tpu.memory_space<vmem>>, %arg7: memref<1x96xf32, #tpu.memory_space<vmem>>, %arg8: memref<1x96xf32, #tpu.memory_space<vmem>>, %arg9: memref<32x128xf32, #tpu.memory_space<vmem>>, %arg10: memref<1x128xf32, #tpu.memory_space<vmem>>, %arg11: memref<8x128xf32, #tpu.memory_space<vmem>>) attributes {dimension_semantics = [], scalar_prefetch = 0 : i64, scratch_operands = 0 : i64, tpu.core_type = #tpu.core_type<tc>} {
    %c0 = arith.constant 0 : index
    %c0_0 = arith.constant 0 : index
    %0 = vector.load %arg2[%c0, %c0_0] : memref<32x96xf32, #tpu.memory_space<vmem>>, vector<32x96xf32>
    %c0_1 = arith.constant 0 : index
    %c0_2 = arith.constant 0 : index
    %1 = vector.load %arg4[%c0_1, %c0_2] : memref<1x96xf32, #tpu.memory_space<vmem>>, vector<1x96xf32>
    %2 = vector.shape_cast %1 : vector<1x96xf32> to vector<1x96xf32>
    %3 = vector.broadcast %2 : vector<1x96xf32> to vector<8x96xf32>
    %c0_3 = arith.constant 0 : index
    %c0_4 = arith.constant 0 : index
    %4 = vector.load %arg0[%c0_3, %c0_4] : memref<64x4xf32, #tpu.memory_space<vmem>>, vector<64x4xf32>
    %c0_5 = arith.constant 0 : index
    %c0_6 = arith.constant 0 : index
    %5 = vector.load %arg1[%c0_5, %c0_6] : memref<4x96xf32, #tpu.memory_space<vmem>>, vector<4x96xf32>
    %cst = arith.constant dense<0.000000e+00> : vector<64x96xf32>
    %6 = tpu.matmul %4, %5, %cst {dimension_numbers = #tpu.dot_dimension_numbers<[1], [0], [0], [1], [0, 0, 1, 1], [], []>} : vector<64x4xf32>, vector<4x96xf32>, vector<64x96xf32> -> vector<64x96xf32>
    %c0_7 = arith.constant 0 : index
    %c0_8 = arith.constant 0 : index
    %7 = vector.load %arg3[%c0_7, %c0_8] : memref<1x96xf32, #tpu.memory_space<vmem>>, vector<1x96xf32>
    %8 = vector.broadcast %7 : vector<1x96xf32> to vector<64x96xf32>
    %9 = arith.addf %6, %8 : vector<64x96xf32>
    %cst_9 = arith.constant 0.000000e+00 : f32
    %10 = vector.broadcast %cst_9 : f32 to vector<8x32xf32>
    %11 = vector.extract_strided_slice %9 {offsets = [0, 0], sizes = [8, 96], strides = [1, 1]} : vector<64x96xf32> to vector<8x96xf32>
    %cst_10 = arith.constant dense<0.000000e+00> : vector<8x96xf32>
    %12 = tpu.matmul %10, %0, %cst_10 {dimension_numbers = #tpu.dot_dimension_numbers<[1], [0], [0], [1], [0, 0, 1, 1], [], []>} : vector<8x32xf32>, vector<32x96xf32>, vector<8x96xf32> -> vector<8x96xf32>
    %13 = arith.addf %12, %3 : vector<8x96xf32>
    %14 = vector.extract_strided_slice %11 {offsets = [0, 0], sizes = [8, 32], strides = [1, 1]} : vector<8x96xf32> to vector<8x32xf32>
    %15 = vector.extract_strided_slice %13 {offsets = [0, 0], sizes = [8, 32], strides = [1, 1]} : vector<8x96xf32> to vector<8x32xf32>
    %16 = arith.addf %14, %15 : vector<8x32xf32>
    %17 = arith.negf %16 : vector<8x32xf32>
    %18 = math.exp %17 : vector<8x32xf32>
    %cst_11 = arith.constant 1.000000e+00 : f32
    %19 = vector.broadcast %cst_11 : f32 to vector<8x32xf32>
    %20 = arith.addf %19, %18 : vector<8x32xf32>
    %21 = arith.divf %19, %20 : vector<8x32xf32>
    %22 = vector.extract_strided_slice %11 {offsets = [0, 32], sizes = [8, 32], strides = [1, 1]} : vector<8x96xf32> to vector<8x32xf32>
    %23 = vector.extract_strided_slice %13 {offsets = [0, 32], sizes = [8, 32], strides = [1, 1]} : vector<8x96xf32> to vector<8x32xf32>
    %24 = arith.addf %22, %23 : vector<8x32xf32>
    %25 = arith.negf %24 : vector<8x32xf32>
    %26 = math.exp %25 : vector<8x32xf32>
    %cst_12 = arith.constant 1.000000e+00 : f32
    %27 = vector.broadcast %cst_12 : f32 to vector<8x32xf32>
    %28 = arith.addf %27, %26 : vector<8x32xf32>
    %29 = arith.divf %27, %28 : vector<8x32xf32>
    %30 = vector.extract_strided_slice %11 {offsets = [0, 64], sizes = [8, 32], strides = [1, 1]} : vector<8x96xf32> to vector<8x32xf32>
    %31 = vector.extract_strided_slice %13 {offsets = [0, 64], sizes = [8, 32], strides = [1, 1]} : vector<8x96xf32> to vector<8x32xf32>
    %32 = arith.mulf %21, %31 : vector<8x32xf32>
    %33 = arith.addf %30, %32 : vector<8x32xf32>
    %34 = math.tanh %33 : vector<8x32xf32>
    %cst_13 = arith.constant 1.000000e+00 : f32
    %35 = vector.broadcast %cst_13 : f32 to vector<8x32xf32>
    %36 = arith.subf %35, %29 : vector<8x32xf32>
    %37 = arith.mulf %36, %34 : vector<8x32xf32>
    %38 = arith.mulf %29, %10 : vector<8x32xf32>
    %39 = arith.addf %37, %38 : vector<8x32xf32>
    %cst_14 = arith.constant 0.000000e+00 : f32
    %40 = vector.broadcast %cst_14 : f32 to vector<8x32xf32>
    %41 = arith.maximumf %39, %40 : vector<8x32xf32>
    %42 = vector.extract_strided_slice %9 {offsets = [8, 0], sizes = [8, 96], strides = [1, 1]} : vector<64x96xf32> to vector<8x96xf32>
    %cst_15 = arith.constant dense<0.000000e+00> : vector<8x96xf32>
    %43 = tpu.matmul %39, %0, %cst_15 {dimension_numbers = #tpu.dot_dimension_numbers<[1], [0], [0], [1], [0, 0, 1, 1], [], []>} : vector<8x32xf32>, vector<32x96xf32>, vector<8x96xf32> -> vector<8x96xf32>
    %44 = arith.addf %43, %3 : vector<8x96xf32>
    %45 = vector.extract_strided_slice %42 {offsets = [0, 0], sizes = [8, 32], strides = [1, 1]} : vector<8x96xf32> to vector<8x32xf32>
    %46 = vector.extract_strided_slice %44 {offsets = [0, 0], sizes = [8, 32], strides = [1, 1]} : vector<8x96xf32> to vector<8x32xf32>
    %47 = arith.addf %45, %46 : vector<8x32xf32>
    %48 = arith.negf %47 : vector<8x32xf32>
    %49 = math.exp %48 : vector<8x32xf32>
    %cst_16 = arith.constant 1.000000e+00 : f32
    %50 = vector.broadcast %cst_16 : f32 to vector<8x32xf32>
    %51 = arith.addf %50, %49 : vector<8x32xf32>
    %52 = arith.divf %50, %51 : vector<8x32xf32>
    %53 = vector.extract_strided_slice %42 {offsets = [0, 32], sizes = [8, 32], strides = [1, 1]} : vector<8x96xf32> to vector<8x32xf32>
    %54 = vector.extract_strided_slice %44 {offsets = [0, 32], sizes = [8, 32], strides = [1, 1]} : vector<8x96xf32> to vector<8x32xf32>
    %55 = arith.addf %53, %54 : vector<8x32xf32>
    %56 = arith.negf %55 : vector<8x32xf32>
    %57 = math.exp %56 : vector<8x32xf32>
    %cst_17 = arith.constant 1.000000e+00 : f32
    %58 = vector.broadcast %cst_17 : f32 to vector<8x32xf32>
    %59 = arith.addf %58, %57 : vector<8x32xf32>
    %60 = arith.divf %58, %59 : vector<8x32xf32>
    %61 = vector.extract_strided_slice %42 {offsets = [0, 64], sizes = [8, 32], strides = [1, 1]} : vector<8x96xf32> to vector<8x32xf32>
    %62 = vector.extract_strided_slice %44 {offsets = [0, 64], sizes = [8, 32], strides = [1, 1]} : vector<8x96xf32> to vector<8x32xf32>
    %63 = arith.mulf %52, %62 : vector<8x32xf32>
    %64 = arith.addf %61, %63 : vector<8x32xf32>
    %65 = math.tanh %64 : vector<8x32xf32>
    %cst_18 = arith.constant 1.000000e+00 : f32
    %66 = vector.broadcast %cst_18 : f32 to vector<8x32xf32>
    %67 = arith.subf %66, %60 : vector<8x32xf32>
    %68 = arith.mulf %67, %65 : vector<8x32xf32>
    %69 = arith.mulf %60, %39 : vector<8x32xf32>
    %70 = arith.addf %68, %69 : vector<8x32xf32>
    %71 = vector.extract_strided_slice %9 {offsets = [16, 0], sizes = [8, 96], strides = [1, 1]} : vector<64x96xf32> to vector<8x96xf32>
    %cst_19 = arith.constant dense<0.000000e+00> : vector<8x96xf32>
    %72 = tpu.matmul %70, %0, %cst_19 {dimension_numbers = #tpu.dot_dimension_numbers<[1], [0], [0], [1], [0, 0, 1, 1], [], []>} : vector<8x32xf32>, vector<32x96xf32>, vector<8x96xf32> -> vector<8x96xf32>
    %73 = arith.addf %72, %3 : vector<8x96xf32>
    %74 = vector.extract_strided_slice %71 {offsets = [0, 0], sizes = [8, 32], strides = [1, 1]} : vector<8x96xf32> to vector<8x32xf32>
    %75 = vector.extract_strided_slice %73 {offsets = [0, 0], sizes = [8, 32], strides = [1, 1]} : vector<8x96xf32> to vector<8x32xf32>
    %76 = arith.addf %74, %75 : vector<8x32xf32>
    %77 = arith.negf %76 : vector<8x32xf32>
    %78 = math.exp %77 : vector<8x32xf32>
    %cst_20 = arith.constant 1.000000e+00 : f32
    %79 = vector.broadcast %cst_20 : f32 to vector<8x32xf32>
    %80 = arith.addf %79, %78 : vector<8x32xf32>
    %81 = arith.divf %79, %80 : vector<8x32xf32>
    %82 = vector.extract_strided_slice %71 {offsets = [0, 32], sizes = [8, 32], strides = [1, 1]} : vector<8x96xf32> to vector<8x32xf32>
    %83 = vector.extract_strided_slice %73 {offsets = [0, 32], sizes = [8, 32], strides = [1, 1]} : vector<8x96xf32> to vector<8x32xf32>
    %84 = arith.addf %82, %83 : vector<8x32xf32>
    %85 = arith.negf %84 : vector<8x32xf32>
    %86 = math.exp %85 : vector<8x32xf32>
    %cst_21 = arith.constant 1.000000e+00 : f32
    %87 = vector.broadcast %cst_21 : f32 to vector<8x32xf32>
    %88 = arith.addf %87, %86 : vector<8x32xf32>
    %89 = arith.divf %87, %88 : vector<8x32xf32>
    %90 = vector.extract_strided_slice %71 {offsets = [0, 64], sizes = [8, 32], strides = [1, 1]} : vector<8x96xf32> to vector<8x32xf32>
    %91 = vector.extract_strided_slice %73 {offsets = [0, 64], sizes = [8, 32], strides = [1, 1]} : vector<8x96xf32> to vector<8x32xf32>
    %92 = arith.mulf %81, %91 : vector<8x32xf32>
    %93 = arith.addf %90, %92 : vector<8x32xf32>
    %94 = math.tanh %93 : vector<8x32xf32>
    %cst_22 = arith.constant 1.000000e+00 : f32
    %95 = vector.broadcast %cst_22 : f32 to vector<8x32xf32>
    %96 = arith.subf %95, %89 : vector<8x32xf32>
    %97 = arith.mulf %96, %94 : vector<8x32xf32>
    %98 = arith.mulf %89, %70 : vector<8x32xf32>
    %99 = arith.addf %97, %98 : vector<8x32xf32>
    %100 = vector.extract_strided_slice %9 {offsets = [24, 0], sizes = [8, 96], strides = [1, 1]} : vector<64x96xf32> to vector<8x96xf32>
    %cst_23 = arith.constant dense<0.000000e+00> : vector<8x96xf32>
    %101 = tpu.matmul %99, %0, %cst_23 {dimension_numbers = #tpu.dot_dimension_numbers<[1], [0], [0], [1], [0, 0, 1, 1], [], []>} : vector<8x32xf32>, vector<32x96xf32>, vector<8x96xf32> -> vector<8x96xf32>
    %102 = arith.addf %101, %3 : vector<8x96xf32>
    %103 = vector.extract_strided_slice %100 {offsets = [0, 0], sizes = [8, 32], strides = [1, 1]} : vector<8x96xf32> to vector<8x32xf32>
    %104 = vector.extract_strided_slice %102 {offsets = [0, 0], sizes = [8, 32], strides = [1, 1]} : vector<8x96xf32> to vector<8x32xf32>
    %105 = arith.addf %103, %104 : vector<8x32xf32>
    %106 = arith.negf %105 : vector<8x32xf32>
    %107 = math.exp %106 : vector<8x32xf32>
    %cst_24 = arith.constant 1.000000e+00 : f32
    %108 = vector.broadcast %cst_24 : f32 to vector<8x32xf32>
    %109 = arith.addf %108, %107 : vector<8x32xf32>
    %110 = arith.divf %108, %109 : vector<8x32xf32>
    %111 = vector.extract_strided_slice %100 {offsets = [0, 32], sizes = [8, 32], strides = [1, 1]} : vector<8x96xf32> to vector<8x32xf32>
    %112 = vector.extract_strided_slice %102 {offsets = [0, 32], sizes = [8, 32], strides = [1, 1]} : vector<8x96xf32> to vector<8x32xf32>
    %113 = arith.addf %111, %112 : vector<8x32xf32>
    %114 = arith.negf %113 : vector<8x32xf32>
    %115 = math.exp %114 : vector<8x32xf32>
    %cst_25 = arith.constant 1.000000e+00 : f32
    %116 = vector.broadcast %cst_25 : f32 to vector<8x32xf32>
    %117 = arith.addf %116, %115 : vector<8x32xf32>
    %118 = arith.divf %116, %117 : vector<8x32xf32>
    %119 = vector.extract_strided_slice %100 {offsets = [0, 64], sizes = [8, 32], strides = [1, 1]} : vector<8x96xf32> to vector<8x32xf32>
    %120 = vector.extract_strided_slice %102 {offsets = [0, 64], sizes = [8, 32], strides = [1, 1]} : vector<8x96xf32> to vector<8x32xf32>
    %121 = arith.mulf %110, %120 : vector<8x32xf32>
    %122 = arith.addf %119, %121 : vector<8x32xf32>
    %123 = math.tanh %122 : vector<8x32xf32>
    %cst_26 = arith.constant 1.000000e+00 : f32
    %124 = vector.broadcast %cst_26 : f32 to vector<8x32xf32>
    %125 = arith.subf %124, %118 : vector<8x32xf32>
    %126 = arith.mulf %125, %123 : vector<8x32xf32>
    %127 = arith.mulf %118, %99 : vector<8x32xf32>
    %128 = arith.addf %126, %127 : vector<8x32xf32>
    %129 = vector.extract_strided_slice %9 {offsets = [32, 0], sizes = [8, 96], strides = [1, 1]} : vector<64x96xf32> to vector<8x96xf32>
    %cst_27 = arith.constant dense<0.000000e+00> : vector<8x96xf32>
    %130 = tpu.matmul %128, %0, %cst_27 {dimension_numbers = #tpu.dot_dimension_numbers<[1], [0], [0], [1], [0, 0, 1, 1], [], []>} : vector<8x32xf32>, vector<32x96xf32>, vector<8x96xf32> -> vector<8x96xf32>
    %131 = arith.addf %130, %3 : vector<8x96xf32>
    %132 = vector.extract_strided_slice %129 {offsets = [0, 0], sizes = [8, 32], strides = [1, 1]} : vector<8x96xf32> to vector<8x32xf32>
    %133 = vector.extract_strided_slice %131 {offsets = [0, 0], sizes = [8, 32], strides = [1, 1]} : vector<8x96xf32> to vector<8x32xf32>
    %134 = arith.addf %132, %133 : vector<8x32xf32>
    %135 = arith.negf %134 : vector<8x32xf32>
    %136 = math.exp %135 : vector<8x32xf32>
    %cst_28 = arith.constant 1.000000e+00 : f32
    %137 = vector.broadcast %cst_28 : f32 to vector<8x32xf32>
    %138 = arith.addf %137, %136 : vector<8x32xf32>
    %139 = arith.divf %137, %138 : vector<8x32xf32>
    %140 = vector.extract_strided_slice %129 {offsets = [0, 32], sizes = [8, 32], strides = [1, 1]} : vector<8x96xf32> to vector<8x32xf32>
    %141 = vector.extract_strided_slice %131 {offsets = [0, 32], sizes = [8, 32], strides = [1, 1]} : vector<8x96xf32> to vector<8x32xf32>
    %142 = arith.addf %140, %141 : vector<8x32xf32>
    %143 = arith.negf %142 : vector<8x32xf32>
    %144 = math.exp %143 : vector<8x32xf32>
    %cst_29 = arith.constant 1.000000e+00 : f32
    %145 = vector.broadcast %cst_29 : f32 to vector<8x32xf32>
    %146 = arith.addf %145, %144 : vector<8x32xf32>
    %147 = arith.divf %145, %146 : vector<8x32xf32>
    %148 = vector.extract_strided_slice %129 {offsets = [0, 64], sizes = [8, 32], strides = [1, 1]} : vector<8x96xf32> to vector<8x32xf32>
    %149 = vector.extract_strided_slice %131 {offsets = [0, 64], sizes = [8, 32], strides = [1, 1]} : vector<8x96xf32> to vector<8x32xf32>
    %150 = arith.mulf %139, %149 : vector<8x32xf32>
    %151 = arith.addf %148, %150 : vector<8x32xf32>
    %152 = math.tanh %151 : vector<8x32xf32>
    %cst_30 = arith.constant 1.000000e+00 : f32
    %153 = vector.broadcast %cst_30 : f32 to vector<8x32xf32>
    %154 = arith.subf %153, %147 : vector<8x32xf32>
    %155 = arith.mulf %154, %152 : vector<8x32xf32>
    %156 = arith.mulf %147, %128 : vector<8x32xf32>
    %157 = arith.addf %155, %156 : vector<8x32xf32>
    %158 = vector.extract_strided_slice %9 {offsets = [40, 0], sizes = [8, 96], strides = [1, 1]} : vector<64x96xf32> to vector<8x96xf32>
    %cst_31 = arith.constant dense<0.000000e+00> : vector<8x96xf32>
    %159 = tpu.matmul %157, %0, %cst_31 {dimension_numbers = #tpu.dot_dimension_numbers<[1], [0], [0], [1], [0, 0, 1, 1], [], []>} : vector<8x32xf32>, vector<32x96xf32>, vector<8x96xf32> -> vector<8x96xf32>
    %160 = arith.addf %159, %3 : vector<8x96xf32>
    %161 = vector.extract_strided_slice %158 {offsets = [0, 0], sizes = [8, 32], strides = [1, 1]} : vector<8x96xf32> to vector<8x32xf32>
    %162 = vector.extract_strided_slice %160 {offsets = [0, 0], sizes = [8, 32], strides = [1, 1]} : vector<8x96xf32> to vector<8x32xf32>
    %163 = arith.addf %161, %162 : vector<8x32xf32>
    %164 = arith.negf %163 : vector<8x32xf32>
    %165 = math.exp %164 : vector<8x32xf32>
    %cst_32 = arith.constant 1.000000e+00 : f32
    %166 = vector.broadcast %cst_32 : f32 to vector<8x32xf32>
    %167 = arith.addf %166, %165 : vector<8x32xf32>
    %168 = arith.divf %166, %167 : vector<8x32xf32>
    %169 = vector.extract_strided_slice %158 {offsets = [0, 32], sizes = [8, 32], strides = [1, 1]} : vector<8x96xf32> to vector<8x32xf32>
    %170 = vector.extract_strided_slice %160 {offsets = [0, 32], sizes = [8, 32], strides = [1, 1]} : vector<8x96xf32> to vector<8x32xf32>
    %171 = arith.addf %169, %170 : vector<8x32xf32>
    %172 = arith.negf %171 : vector<8x32xf32>
    %173 = math.exp %172 : vector<8x32xf32>
    %cst_33 = arith.constant 1.000000e+00 : f32
    %174 = vector.broadcast %cst_33 : f32 to vector<8x32xf32>
    %175 = arith.addf %174, %173 : vector<8x32xf32>
    %176 = arith.divf %174, %175 : vector<8x32xf32>
    %177 = vector.extract_strided_slice %158 {offsets = [0, 64], sizes = [8, 32], strides = [1, 1]} : vector<8x96xf32> to vector<8x32xf32>
    %178 = vector.extract_strided_slice %160 {offsets = [0, 64], sizes = [8, 32], strides = [1, 1]} : vector<8x96xf32> to vector<8x32xf32>
    %179 = arith.mulf %168, %178 : vector<8x32xf32>
    %180 = arith.addf %177, %179 : vector<8x32xf32>
    %181 = math.tanh %180 : vector<8x32xf32>
    %cst_34 = arith.constant 1.000000e+00 : f32
    %182 = vector.broadcast %cst_34 : f32 to vector<8x32xf32>
    %183 = arith.subf %182, %176 : vector<8x32xf32>
    %184 = arith.mulf %183, %181 : vector<8x32xf32>
    %185 = arith.mulf %176, %157 : vector<8x32xf32>
    %186 = arith.addf %184, %185 : vector<8x32xf32>
    %187 = vector.extract_strided_slice %9 {offsets = [48, 0], sizes = [8, 96], strides = [1, 1]} : vector<64x96xf32> to vector<8x96xf32>
    %cst_35 = arith.constant dense<0.000000e+00> : vector<8x96xf32>
    %188 = tpu.matmul %186, %0, %cst_35 {dimension_numbers = #tpu.dot_dimension_numbers<[1], [0], [0], [1], [0, 0, 1, 1], [], []>} : vector<8x32xf32>, vector<32x96xf32>, vector<8x96xf32> -> vector<8x96xf32>
    %189 = arith.addf %188, %3 : vector<8x96xf32>
    %190 = vector.extract_strided_slice %187 {offsets = [0, 0], sizes = [8, 32], strides = [1, 1]} : vector<8x96xf32> to vector<8x32xf32>
    %191 = vector.extract_strided_slice %189 {offsets = [0, 0], sizes = [8, 32], strides = [1, 1]} : vector<8x96xf32> to vector<8x32xf32>
    %192 = arith.addf %190, %191 : vector<8x32xf32>
    %193 = arith.negf %192 : vector<8x32xf32>
    %194 = math.exp %193 : vector<8x32xf32>
    %cst_36 = arith.constant 1.000000e+00 : f32
    %195 = vector.broadcast %cst_36 : f32 to vector<8x32xf32>
    %196 = arith.addf %195, %194 : vector<8x32xf32>
    %197 = arith.divf %195, %196 : vector<8x32xf32>
    %198 = vector.extract_strided_slice %187 {offsets = [0, 32], sizes = [8, 32], strides = [1, 1]} : vector<8x96xf32> to vector<8x32xf32>
    %199 = vector.extract_strided_slice %189 {offsets = [0, 32], sizes = [8, 32], strides = [1, 1]} : vector<8x96xf32> to vector<8x32xf32>
    %200 = arith.addf %198, %199 : vector<8x32xf32>
    %201 = arith.negf %200 : vector<8x32xf32>
    %202 = math.exp %201 : vector<8x32xf32>
    %cst_37 = arith.constant 1.000000e+00 : f32
    %203 = vector.broadcast %cst_37 : f32 to vector<8x32xf32>
    %204 = arith.addf %203, %202 : vector<8x32xf32>
    %205 = arith.divf %203, %204 : vector<8x32xf32>
    %206 = vector.extract_strided_slice %187 {offsets = [0, 64], sizes = [8, 32], strides = [1, 1]} : vector<8x96xf32> to vector<8x32xf32>
    %207 = vector.extract_strided_slice %189 {offsets = [0, 64], sizes = [8, 32], strides = [1, 1]} : vector<8x96xf32> to vector<8x32xf32>
    %208 = arith.mulf %197, %207 : vector<8x32xf32>
    %209 = arith.addf %206, %208 : vector<8x32xf32>
    %210 = math.tanh %209 : vector<8x32xf32>
    %cst_38 = arith.constant 1.000000e+00 : f32
    %211 = vector.broadcast %cst_38 : f32 to vector<8x32xf32>
    %212 = arith.subf %211, %205 : vector<8x32xf32>
    %213 = arith.mulf %212, %210 : vector<8x32xf32>
    %214 = arith.mulf %205, %186 : vector<8x32xf32>
    %215 = arith.addf %213, %214 : vector<8x32xf32>
    %216 = vector.extract_strided_slice %9 {offsets = [56, 0], sizes = [8, 96], strides = [1, 1]} : vector<64x96xf32> to vector<8x96xf32>
    %cst_39 = arith.constant dense<0.000000e+00> : vector<8x96xf32>
    %217 = tpu.matmul %215, %0, %cst_39 {dimension_numbers = #tpu.dot_dimension_numbers<[1], [0], [0], [1], [0, 0, 1, 1], [], []>} : vector<8x32xf32>, vector<32x96xf32>, vector<8x96xf32> -> vector<8x96xf32>
    %218 = arith.addf %217, %3 : vector<8x96xf32>
    %219 = vector.extract_strided_slice %216 {offsets = [0, 0], sizes = [8, 32], strides = [1, 1]} : vector<8x96xf32> to vector<8x32xf32>
    %220 = vector.extract_strided_slice %218 {offsets = [0, 0], sizes = [8, 32], strides = [1, 1]} : vector<8x96xf32> to vector<8x32xf32>
    %221 = arith.addf %219, %220 : vector<8x32xf32>
    %222 = arith.negf %221 : vector<8x32xf32>
    %223 = math.exp %222 : vector<8x32xf32>
    %cst_40 = arith.constant 1.000000e+00 : f32
    %224 = vector.broadcast %cst_40 : f32 to vector<8x32xf32>
    %225 = arith.addf %224, %223 : vector<8x32xf32>
    %226 = arith.divf %224, %225 : vector<8x32xf32>
    %227 = vector.extract_strided_slice %216 {offsets = [0, 32], sizes = [8, 32], strides = [1, 1]} : vector<8x96xf32> to vector<8x32xf32>
    %228 = vector.extract_strided_slice %218 {offsets = [0, 32], sizes = [8, 32], strides = [1, 1]} : vector<8x96xf32> to vector<8x32xf32>
    %229 = arith.addf %227, %228 : vector<8x32xf32>
    %230 = arith.negf %229 : vector<8x32xf32>
    %231 = math.exp %230 : vector<8x32xf32>
    %cst_41 = arith.constant 1.000000e+00 : f32
    %232 = vector.broadcast %cst_41 : f32 to vector<8x32xf32>
    %233 = arith.addf %232, %231 : vector<8x32xf32>
    %234 = arith.divf %232, %233 : vector<8x32xf32>
    %235 = vector.extract_strided_slice %216 {offsets = [0, 64], sizes = [8, 32], strides = [1, 1]} : vector<8x96xf32> to vector<8x32xf32>
    %236 = vector.extract_strided_slice %218 {offsets = [0, 64], sizes = [8, 32], strides = [1, 1]} : vector<8x96xf32> to vector<8x32xf32>
    %237 = arith.mulf %226, %236 : vector<8x32xf32>
    %238 = arith.addf %235, %237 : vector<8x32xf32>
    %239 = math.tanh %238 : vector<8x32xf32>
    %cst_42 = arith.constant 1.000000e+00 : f32
    %240 = vector.broadcast %cst_42 : f32 to vector<8x32xf32>
    %241 = arith.subf %240, %234 : vector<8x32xf32>
    %242 = arith.mulf %241, %239 : vector<8x32xf32>
    %243 = arith.mulf %234, %215 : vector<8x32xf32>
    %244 = arith.addf %242, %243 : vector<8x32xf32>
    %c0_43 = arith.constant 0 : index
    %c0_44 = arith.constant 0 : index
    %245 = vector.load %arg8[%c0_43, %c0_44] : memref<1x96xf32, #tpu.memory_space<vmem>>, vector<1x96xf32>
    %246 = vector.shape_cast %245 : vector<1x96xf32> to vector<1x96xf32>
    %247 = vector.broadcast %246 : vector<1x96xf32> to vector<8x96xf32>
    %c0_45 = arith.constant 0 : index
    %c0_46 = arith.constant 0 : index
    %248 = vector.load %arg5[%c0_45, %c0_46] : memref<32x96xf32, #tpu.memory_space<vmem>>, vector<32x96xf32>
    %cst_47 = arith.constant dense<0.000000e+00> : vector<8x96xf32>
    %249 = tpu.matmul %41, %248, %cst_47 {dimension_numbers = #tpu.dot_dimension_numbers<[1], [0], [0], [1], [0, 0, 1, 1], [], []>} : vector<8x32xf32>, vector<32x96xf32>, vector<8x96xf32> -> vector<8x96xf32>
    %c0_48 = arith.constant 0 : index
    %c0_49 = arith.constant 0 : index
    %250 = vector.load %arg7[%c0_48, %c0_49] : memref<1x96xf32, #tpu.memory_space<vmem>>, vector<1x96xf32>
    %251 = vector.broadcast %250 : vector<1x96xf32> to vector<8x96xf32>
    %252 = arith.addf %249, %251 : vector<8x96xf32>
    %c0_50 = arith.constant 0 : index
    %c0_51 = arith.constant 0 : index
    %253 = vector.load %arg6[%c0_50, %c0_51] : memref<32x96xf32, #tpu.memory_space<vmem>>, vector<32x96xf32>
    %cst_52 = arith.constant dense<0.000000e+00> : vector<8x96xf32>
    %254 = tpu.matmul %244, %253, %cst_52 {dimension_numbers = #tpu.dot_dimension_numbers<[1], [0], [0], [1], [0, 0, 1, 1], [], []>} : vector<8x32xf32>, vector<32x96xf32>, vector<8x96xf32> -> vector<8x96xf32>
    %255 = arith.addf %254, %247 : vector<8x96xf32>
    %256 = vector.extract_strided_slice %252 {offsets = [0, 0], sizes = [8, 32], strides = [1, 1]} : vector<8x96xf32> to vector<8x32xf32>
    %257 = vector.extract_strided_slice %255 {offsets = [0, 0], sizes = [8, 32], strides = [1, 1]} : vector<8x96xf32> to vector<8x32xf32>
    %258 = arith.addf %256, %257 : vector<8x32xf32>
    %259 = arith.negf %258 : vector<8x32xf32>
    %260 = math.exp %259 : vector<8x32xf32>
    %cst_53 = arith.constant 1.000000e+00 : f32
    %261 = vector.broadcast %cst_53 : f32 to vector<8x32xf32>
    %262 = arith.addf %261, %260 : vector<8x32xf32>
    %263 = arith.divf %261, %262 : vector<8x32xf32>
    %264 = vector.extract_strided_slice %252 {offsets = [0, 32], sizes = [8, 32], strides = [1, 1]} : vector<8x96xf32> to vector<8x32xf32>
    %265 = vector.extract_strided_slice %255 {offsets = [0, 32], sizes = [8, 32], strides = [1, 1]} : vector<8x96xf32> to vector<8x32xf32>
    %266 = arith.addf %264, %265 : vector<8x32xf32>
    %267 = arith.negf %266 : vector<8x32xf32>
    %268 = math.exp %267 : vector<8x32xf32>
    %cst_54 = arith.constant 1.000000e+00 : f32
    %269 = vector.broadcast %cst_54 : f32 to vector<8x32xf32>
    %270 = arith.addf %269, %268 : vector<8x32xf32>
    %271 = arith.divf %269, %270 : vector<8x32xf32>
    %272 = vector.extract_strided_slice %252 {offsets = [0, 64], sizes = [8, 32], strides = [1, 1]} : vector<8x96xf32> to vector<8x32xf32>
    %273 = vector.extract_strided_slice %255 {offsets = [0, 64], sizes = [8, 32], strides = [1, 1]} : vector<8x96xf32> to vector<8x32xf32>
    %274 = arith.mulf %263, %273 : vector<8x32xf32>
    %275 = arith.addf %272, %274 : vector<8x32xf32>
    %276 = math.tanh %275 : vector<8x32xf32>
    %cst_55 = arith.constant 1.000000e+00 : f32
    %277 = vector.broadcast %cst_55 : f32 to vector<8x32xf32>
    %278 = arith.subf %277, %271 : vector<8x32xf32>
    %279 = arith.mulf %278, %276 : vector<8x32xf32>
    %280 = arith.mulf %271, %244 : vector<8x32xf32>
    %281 = arith.addf %279, %280 : vector<8x32xf32>
    %c0_56 = arith.constant 0 : index
    %c0_57 = arith.constant 0 : index
    %282 = vector.load %arg9[%c0_56, %c0_57] : memref<32x128xf32, #tpu.memory_space<vmem>>, vector<32x128xf32>
    %cst_58 = arith.constant dense<0.000000e+00> : vector<8x128xf32>
    %283 = tpu.matmul %281, %282, %cst_58 {dimension_numbers = #tpu.dot_dimension_numbers<[1], [0], [0], [1], [0, 0, 1, 1], [], []>} : vector<8x32xf32>, vector<32x128xf32>, vector<8x128xf32> -> vector<8x128xf32>
    %c0_59 = arith.constant 0 : index
    %c0_60 = arith.constant 0 : index
    %284 = vector.load %arg10[%c0_59, %c0_60] : memref<1x128xf32, #tpu.memory_space<vmem>>, vector<1x128xf32>
    %285 = vector.broadcast %284 : vector<1x128xf32> to vector<8x128xf32>
    %286 = arith.addf %283, %285 : vector<8x128xf32>
    %cst_61 = arith.constant 0.000000e+00 : f32
    %287 = vector.broadcast %cst_61 : f32 to vector<8x128xf32>
    %288 = arith.maximumf %286, %287 : vector<8x128xf32>
    %c0_62 = arith.constant 0 : index
    %c0_63 = arith.constant 0 : index
    %289 = vector.load %arg11[%c0_62, %c0_63] : memref<8x128xf32, #tpu.memory_space<vmem>>, vector<8x128xf32>
    tpu.vector_store %arg11[%c0_62, %c0_63], %288 {strides = array<i32>} : memref<8x128xf32, #tpu.memory_space<vmem>>, vector<8x128xf32>,
    return
  }
}

</mosaic_0001>

<bundles_post_ra>
// kernel: tpu_custom_call.1
= control target key start
LH: loop header
LB: loop body
LE: loop exit
PB: predicated region body
PF: predicated region fallthrough
CT: control target
= control target key end

     0   :  { %16 = vsyncpa [#allocation3], 0  ;;  %s2200_s0 = inlined_call_operand.vmem [shape: f32[64,4], index: 0, kind: input, shape index: {}]   ;;  %s2201_s1 = inlined_call_operand.hbm [shape: f32[4,96], index: 1, kind: input, shape index: {}]   ;;  %s2202_s2 = inlined_call_operand.vmem [shape: f32[32,96], index: 2, kind: input, shape index: {}]   ;;  %s2203_s3 = inlined_call_operand.vmem [shape: f32[1,96], index: 3, kind: input, shape index: {}]   ;;  %s2204_s4 = inlined_call_operand.vmem [shape: f32[1,96], index: 4, kind: input, shape index: {}]   ;;  %s2205_s5 = inlined_call_operand.vmem [shape: f32[32,96], index: 5, kind: input, shape index: {}]   ;;  %s2206_s6 = inlined_call_operand.hbm [shape: f32[32,96], index: 6, kind: input, shape index: {}]   ;;  %s2207_s7 = inlined_call_operand.hbm [shape: f32[1,96], index: 7, kind: input, shape index: {}]   ;;  %s2208_s8 = inlined_call_operand.hbm [shape: f32[1,96], index: 8, kind: input, shape index: {}]   ;;  %s2209_s9 = inlined_call_operand.vmem [shape: f32[32,128], index: 9, kind: input, shape index: {}]   ;;  %s2210_s10 = inlined_call_operand.vmem [shape: f32[1,128], index: 10, kind: input, shape index: {}]   ;;  %s2211_s11 = inlined_call_operand.hbm [shape: f32[8,128], index: 11, kind: output, shape index: {}]  }
   0x1   :  { %17 = vsyncpa [#allocation6], 0 }
   0x2   :  { %18 = vsyncpa [#allocation9], 0 }
   0x3   :  { %19 = vsyncpa [#allocation4], 0  ;;  %s1842_s17 = smov [#allocation5]   ;;  %s1724_s21 = scalar_lea.hbm %s2206_s6, 512 }
   0x4   :  { %s45_s18 = sshll.u32 %s1842_s17, 4  ;;  %p1725_p0 = scmp.ne.s32.totalorder %s2206_s6, %s1724_s21  ;;  %s46_s18 = int_to_ptr.vmem [resolvable:$true] %s45_s18 }
   0x5   :  { %p1728_p1 = scmp.lt.u32.totalorder %s1724_s21, %s2206_s6 }
   0x7   :  { %p1730_p2 = pnand %p1728_p1, %p1725_p0 }
   0x9   :  { %1733 = shalt.err (!%p1730_p2)
}
   0xa   :  { %s1734_s26 = scalar_lea.vmem %s46_s18, 512  ;;  %p1739_p4 = scmp.lt.s32.totalorder %s46_s18, %s46_s18 }
   0xb   :  { %p1735_p3 = scmp.ne.s32.totalorder %s46_s18, %s1734_s26  ;;  %p1740_p5 = scmp.lt.s32.totalorder %s1734_s26, %s1734_s26 }
   0xd   :  { %p1741_p6 = por %p1740_p5, %p1739_p4 }
   0xf   :  { %p1742_p7 = pnand %p1741_p6, %p1735_p3 }
  0x11   :  { %1745 = shalt.err (!%p1742_p7)
}
  0x12   :  { %s1843_s27 = smov 128   ;;  %s1844_s28 = smov 8  }
  0x13   :  { %51 = dma.hbm_to_vmem [thread:$0]  %s2206_s6, 512, %s46_s18, [#allocation6], %s1843_s27, %s1843_s27, %s1844_s28  }
  0x14   :  { %s1845_s12 = smov [#allocation2]   ;;  %s1846_s14 = smov [#allocation7]  }
  0x15   :  { %s28_s13 = sshll.u32 %s1845_s12, 4  ;;  %s58_s15 = sshll.u32 %s1846_s14, 4  ;;  %s29_s13 = int_to_ptr.vmem [resolvable:$true] %s28_s13  ;;  %s59_s15 = int_to_ptr.vmem [resolvable:$true] %s58_s15 }
  0x16   :  { %s1746_s19 = scalar_lea.hbm %s2201_s1, 64 }
  0x17   :  { %p1747_p8 = scmp.ne.s32.totalorder %s2201_s1, %s1746_s19  ;;  %p1750_p9 = scmp.lt.u32.totalorder %s1746_s19, %s2201_s1 }
  0x19   :  { %p1752_p10 = pnand %p1750_p9, %p1747_p8 }
  0x1b   :  { %1755 = shalt.err (!%p1752_p10)
}
  0x1c   :  { %s1756_s6 = scalar_lea.vmem %s29_s13, 64  ;;  %p1761_p12 = scmp.lt.s32.totalorder %s29_s13, %s29_s13 }
  0x1d   :  { %p1757_p11 = scmp.ne.s32.totalorder %s29_s13, %s1756_s6  ;;  %p1762_p13 = scmp.lt.s32.totalorder %s1756_s6, %s1756_s6 }
  0x1f   :  { %p1763_p0 = por %p1762_p13, %p1761_p12 }
  0x21   :  { %p1764_p1 = pnand %p1763_p0, %p1757_p11 }
  0x23   :  { %1767 = shalt.err (!%p1764_p1)
}
  0x24   :  { %31 = dma.hbm_to_vmem [thread:$0]  %s2201_s1, 64, %s29_s13, [#allocation3]  }
  0x25   :  { %s1768_s27 = scalar_lea.hbm %s2207_s7, 16 }
  0x26   :  { %p1769_p2 = scmp.ne.s32.totalorder %s2207_s7, %s1768_s27  ;;  %p1772_p3 = scmp.lt.u32.totalorder %s1768_s27, %s2207_s7 }
  0x28   :  { %p1774_p4 = pnand %p1772_p3, %p1769_p2 }
  0x2a   :  { %1777 = shalt.err (!%p1774_p4)
}
  0x2b   :  { %s1778_s14 = scalar_lea.vmem %s59_s15, 16  ;;  %s1782_s16 = scalar_lea.vmem %s59_s15, 32 }
  0x2c   :  { %p1779_p5 = scmp.ne.s32.totalorder %s59_s15, %s1778_s14  ;;  %p1783_p6 = scmp.lt.s32.totalorder %s59_s15, %s59_s15 }
  0x2d   :  { %p1784_p7 = scmp.lt.s32.totalorder %s1782_s16, %s1778_s14 }
  0x2f   :  { %p1785_p8 = por %p1784_p7, %p1783_p6 }
  0x31   :  { %p1786_p9 = pnand %p1785_p8, %p1779_p5 }
  0x33   :  { %1789 = shalt.err (!%p1786_p9)
}
  0x34   :  { %61 = dma.hbm_to_vmem [thread:$0]  %s2207_s7, 16, %s59_s15, [#allocation6]  }
  0x35   :  { %s1847_s17 = smov [#allocation8]   ;;  %s1790_s22 = scalar_lea.hbm %s2208_s8, 16 }
  0x36   :  { %s68_s19 = sshll.u32 %s1847_s17, 4  ;;  %p1791_p10 = scmp.ne.s32.totalorder %s2208_s8, %s1790_s22  ;;  %s69_s19 = int_to_ptr.vmem [resolvable:$true] %s68_s19 }
  0x37   :  { %p1794_p11 = scmp.lt.u32.totalorder %s1790_s22, %s2208_s8 }
  0x39   :  { %p1796_p12 = pnand %p1794_p11, %p1791_p10 }
  0x3b   :  { %1799 = shalt.err (!%p1796_p12)
}
  0x3c   :  { %s1800_s25 = scalar_lea.vmem %s69_s19, 16  ;;  %s1804_s7 = scalar_lea.vmem %s69_s19, 32 }
  0x3d   :  { %p1801_p13 = scmp.ne.s32.totalorder %s69_s19, %s1800_s25  ;;  %p1805_p0 = scmp.lt.s32.totalorder %s69_s19, %s69_s19 }
  0x3e   :  { %p1806_p1 = scmp.lt.s32.totalorder %s1804_s7, %s1800_s25 }
  0x40   :  { %p1807_p2 = por %p1806_p1, %p1805_p0 }
  0x42   :  { %p1808_p3 = pnand %p1807_p2, %p1801_p13 }
  0x44   :  { %1811 = shalt.err (!%p1808_p3)
}
  0x45   :  { %71 = dma.hbm_to_vmem [thread:$0]  %s2208_s8, 16, %s69_s19, [#allocation9]  }
  0x46   :  { %1834 = dma.done.wait [#allocation3], 64  }
  0x47   :  { %1835 = vsyncadd [#allocation3], 4294967232 }
  0x48   :  { %1836 = dma.done.wait [#allocation6], 528  }
  0x49   :  { %1837 = vsyncadd [#allocation6], 4294966768 }
  0x4a   :  { %1838 = dma.done.wait [#allocation9], 16  }
  0x4b   :  { %1839 = vsyncadd [#allocation9], 4294967280  ;;  %v1848_v0 = vmov 0.0|0.0   ;;  %vm1849_vm0 = vmmov 0   ;;  %v1850_v1 = vmov 0.0   ;;  %vm140_vm1 = vcmask 1043456  }
  0x4c   :  { %1592 = vmatprep.subr.bf16.mxu1 %v1848_v0  ;;  %1479 = vmatprep.mubr.msk.f32.mxu1 %vm1849_vm0, %v1850_v1  ;;  %vm115_vm2 = vcmask 31744   ;;  %v88_v2 = vld [vmem:[%s2202_s2] sm:$0xff]  ;;  %v89_v3 = vld [vmem:[%s2202_s2 + $0x8] sm:$0xff]  ;;  %v90_v6 = vld [vmem:[%s2202_s2 + $0x10] sm:$0xff]  ;;  %s1851_s21 = smov 64   ;;  %vm249_vm3 = vcmask 261120  }
  0x4d   :  { %v107_v4 = vld [vmem:[#allocation2] sm:$0xf]  ;;  %v1971_v5 = vpack.c.bf16 %v89_v3, %v88_v2  ;;  %v91_v7 = vld [vmem:[%s2202_s2 + $0x18] sm:$0xff]  ;;  %v100_v9 = vld [vmem:[%s2200_s0 + $0x8] sm:$0xff]  ;;  %s1853_s18 = smov [#allocation10]  }
  0x4e   :  { %1457 = vmatprep.subr.msk.mxu0 %vm140_vm1, %v107_v4  ;;  %v99_v8 = vld [vmem:[%s2200_s0] sm:$0xff]  ;;  %v1987_v10 = vpack.c.bf16 %v91_v7, %v90_v6  ;;  %v101_v48 = vld [vmem:[%s2200_s0 + $0x10] sm:$0xff]  ;;  %v102_v49 = vld [vmem:[%s2200_s0 + $0x18] sm:$0xff]  ;;  %s1349_s24 = sshll.u32 %s1853_s18, 4  ;;  %s1350_s24 = int_to_ptr.vmem [resolvable:$true] %s1349_s24 }
  0x4f   :  { %1458 = vmatpush3.msk.msra.mxu0 %vm140_vm1, %v107_v4  ;;  %1459 = vmatprep.mubr.msk.f32.mxu0 %vm115_vm2, %v99_v8  ;;  %v2008_v13 = vld [vmem:[%s2204_s4] ss:$0 sm:$0xff]  ;;  %s1852_s4 = smov 96   ;;  %v104_v51 = vld [vmem:[%s2200_s0 + $0x28] sm:$0xff]  ;;  %v105_v52 = vld [vmem:[%s2200_s0 + $0x30] sm:$0xff]  ;;  %s1812_s25 = scalar_lea.vmem %s1350_s24, 128 }
  0x50   :  { %1594 = vmatpush3.bf16.msra.mxu1 %v1971_v5  ;;  %1460 = vmatmul.mubr.msk.f32.vlgmr.msra.gmra.mrb[0].mxu0 %vm115_vm2, %v100_v9  ;;  %v2015_v17 = vld [vmem:[%s2203_s3] ss:$0 sm:$0xff]  ;;  %v106_v53 = vld [vmem:[%s2200_s0 + $0x38] sm:$0xff]  ;;  %p1813_p4 = scmp.ne.s32.totalorder %s1350_s24, %s1812_s25  ;;  %p1817_p5 = scmp.lt.s32.totalorder %s1350_s24, %s1350_s24 }
  0x51   :  { %1595 = vmatprep.subr.bf16.mxu1 %v1848_v0  ;;  %1604 = vmatprep.subr.bf16.mxu0 %v1848_v0  ;;  %v103_v50 = vld [vmem:[%s2200_s0 + $0x20] sm:$0xff]  ;;  %p1818_p6 = scmp.lt.s32.totalorder %s1812_s25, %s1812_s25 }
  0x52   :  { %1606 = vmatpush3.bf16.msra.mxu0 %v1971_v5  ;;  %1462 = vmatprep.mubr.msk.f32.mxu0 %vm115_vm2, %v101_v48 }
  0x53   :  { %1607 = vmatprep.subr.bf16.mxu0 %v1848_v0  ;;  %p1819_p7 = por %p1818_p6, %p1817_p5 }
  0x54   :  { %1597 = vmatpush3.bf16.msra.mxu1 %v1987_v10  ;;  %1463 = vmatmul.mubr.msk.f32.gmra.mrb[2].mxu0 %vm115_vm2, %v102_v49 }
  0x55   :  { %1598 = vmatprep.subr.bf16.mxu1 %v1848_v0  ;;  %1465 = vmatprep.mubr.msk.f32.mxu0 %vm115_vm2, %v103_v50  ;;  %p1820_p8 = pnand %p1819_p7, %p1813_p4 }
  0x56   :  { %1609 = vmatpush3.bf16.msra.mxu0 %v1987_v10 }
  0x57   :  { %1480 = vmatmul.mubr.f32.vlgmr.msra.gmra.mrb[0].mxu1 %v1850_v1  ;;  %1616 = vmatprep.subr.bf16.mxu0 %v1848_v0 }
  0x58   :  { %1600 = vmatpush3.bf16.msra.mxu1 %v1971_v5  ;;  %1490 = vmatprep.mubr.msk.f32.mxu1 %vm1849_vm0, %v1850_v1 }
  0x59   :  { %1601 = vmatprep.subr.bf16.mxu1 %v1848_v0  ;;  %1466 = vmatmul.mubr.msk.f32.gmra.mrb[4].mxu0 %vm115_vm2, %v104_v51 }
  0x5a   :  { %1468 = vmatprep.mubr.msk.f32.mxu0 %vm115_vm2, %v105_v52 }
  0x5c   :  { %1603 = vmatpush3.bf16.msra.mxu1 %v1987_v10 }
  0x5d   :  { %1610 = vmatprep.subr.bf16.mxu1 %v1848_v0  ;;  %1469 = vmatmul.mubr.msk.f32.gmra.mrb[6].mxu0 %vm115_vm2, %v106_v53 }
  0x5e   :  { %1501 = vmatprep.mubr.msk.f32.mxu0 %vm1849_vm0, %v1850_v1 }
 0x123   :  { %v1461_v11 = vpop.f32.mrb[0].mxu0 }
 0x124   :  { %v210_v12 = vpop.f32.mrb[1].mxu0  ;;  %v216_v38 = vadd.f32 %v1461_v11, %v2015_v17 }
 0x125   :  { %v211_v18 = vadd.f32 %v2015_v17, %v210_v12 }
 0x127   :  { %v1464_v60 = vpop.f32.mrb[2].mxu0 }
 0x128   :  { %v220_v61 = vpop.f32.mrb[3].mxu0 }
 0x129   :  { %v221_v9 = vadd.f32 %v2015_v17, %v220_v61 }
 0x12a   :  { %v319_v14 = vpop.f32.mrb[0].mxu1 }
 0x12b   :  { %v320_v15 = vadd.f32 %v2008_v13, %v319_v14  ;;  %v1481_v16 = vpop.f32.mrb[1].mxu1 }
 0x12c   :  { %v2064_v62 = vpop.f32.mrb[4].mxu0 }
 0x12d   :  { %331 = vrot.lane.b32.xlu0 %v320_v15, %s1851_s21  ;;  %v323_v19 = vadd.f32 %v320_v15, %v211_v18  ;;  %v2066_v63 = vpop.f32.mrb[5].mxu0 }
 0x12e   :  { %v231_v53 = vadd.f32 %v2015_v17, %v2066_v63 }
 0x12f   :  { %v1371_v20 = vmul.f32 -1.442695, %v323_v19 }
 0x130   :  { %v2068_v2 = vpop.f32.mrb[6].mxu0 }
 0x131   :  { %1670 = vpow2.f32 %v1371_v20  ;;  %v2070_v3 = vpop.f32.mrb[7].mxu0 }
 0x13b   :  { %v1671_v21 = vpop.eup %1670 }
 0x13c   :  { %v327_v22 = vadd.f32 1.0, %v1671_v21 }
 0x13e   :  { %1672 = vrcp.f32 %v327_v22 }
 0x148   :  { %v1673_v23 = vpop.eup %1672 }
 0x149   :  { %v341_v29 = vsub.f32 1.0, %v1673_v23  ;;  %v347_v31 = vmul.f32 0.0, %v1673_v23 }
 0x19f   :  { %v332_v24 = vpop.permute.xlu0 %331 }
 0x1a0   :  { %v334_v25 = vmul.f32 %v1673_v23, %v332_v24 }
 0x1a2   :  { %336 = vrot.lane.b32.xlu0 %v334_v25, %s1851_s21 }
 0x214   :  { %v337_v26 = vpop.permute.xlu0 %336 }
 0x215   :  { %v339_v27 = vadd.f32 %v337_v26, %v211_v18 }
 0x217   :  { %1674 = vtanh.f32 %v339_v27 }
 0x221   :  { %v1675_v28 = vpop.eup %1674 }
 0x222   :  { %343 = vrot.lane.b32.xlu1 %v1675_v28, %s1852_s4 }
 0x294   :  { %v344_v30 = vpop.permute.xlu1 %343 }
 0x295   :  { %v346_v32 = vmul.f32 %v344_v30, %v341_v29 }
 0x297   :  { %v2020_v33 = vadd.f32 %v347_v31, %v346_v32  ;;  %v226_v32 = vadd.f32 %v1464_v60, %v2015_v17 }
 0x299   :  { %351 = vrot.lane.b32.xlu1 %v2020_v33, %s1852_s4 }
 0x30b   :  { %v352_v34 = vpop.permute.xlu1 %351 }
 0x30c   :  { %1491 = vmatmul.mubr.msk.f32.vlgmr.msra.gmra.mrb[2].mxu1 %vm249_vm3, %v352_v34 }
 0x30d   :  { %1612 = vmatpush3.bf16.msra.mxu1 %v1971_v5  ;;  %1512 = vmatprep.mubr.msk.f32.mxu1 %vm1849_vm0, %v1850_v1 }
 0x30e   :  { %1613 = vmatprep.subr.bf16.mxu1 %v1848_v0 }
 0x311   :  { %1615 = vmatpush3.bf16.msra.mxu1 %v1987_v10 }
 0x312   :  { %1622 = vmatprep.subr.bf16.mxu1 %v1848_v0 }
 0x3df   :  { %v421_v35 = vpop.f32.mrb[2].mxu1 }
 0x3e0   :  { %v422_v36 = vadd.f32 %v2008_v13, %v421_v35  ;;  %v1492_v37 = vpop.f32.mrb[3].mxu1 }
 0x3e2   :  { %433 = vrot.lane.b32.xlu0 %v422_v36, %s1851_s21  ;;  %v425_v39 = vadd.f32 %v422_v36, %v216_v38 }
 0x3e4   :  { %v1373_v40 = vmul.f32 -1.442695, %v425_v39 }
 0x3e6   :  { %1676 = vpow2.f32 %v1373_v40 }
 0x3f0   :  { %v1677_v41 = vpop.eup %1676 }
 0x3f1   :  { %v429_v42 = vadd.f32 1.0, %v1677_v41 }
 0x3f3   :  { %1678 = vrcp.f32 %v429_v42 }
 0x3fd   :  { %v1679_v43 = vpop.eup %1678 }
 0x3fe   :  { %v443_v55 = vsub.f32 1.0, %v1679_v43  ;;  %v449_v57 = vmul.f32 %v1679_v43, %v2020_v33 }
 0x454   :  { %v434_v44 = vpop.permute.xlu0 %433 }
 0x455   :  { %v436_v45 = vmul.f32 %v1679_v43, %v434_v44 }
 0x457   :  { %438 = vrot.lane.b32.xlu1 %v436_v45, %s1851_s21 }
 0x4c9   :  { %v439_v46 = vpop.permute.xlu1 %438 }
 0x4ca   :  { %v441_v47 = vadd.f32 %v439_v46, %v216_v38 }
 0x4cc   :  { %1680 = vtanh.f32 %v441_v47 }
 0x4d6   :  { %v1681_v54 = vpop.eup %1680 }
 0x4d7   :  { %445 = vrot.lane.b32.xlu0 %v1681_v54, %s1852_s4 }
 0x549   :  { %v446_v56 = vpop.permute.xlu0 %445 }
 0x54a   :  { %v448_v58 = vmul.f32 %v446_v56, %v443_v55 }
 0x54c   :  { %v450_v59 = vadd.f32 %v449_v57, %v448_v58 }
 0x54e   :  { %452 = vrot.lane.b32.xlu1 %v450_v59, %s1852_s4 }
 0x5c0   :  { %v453_v4 = vpop.permute.xlu1 %452 }
 0x5c1   :  { %1502 = vmatmul.mubr.msk.f32.vlgmr.msra.gmra.mrb[8].mxu0 %vm249_vm3, %v453_v4 }
 0x5c2   :  { %1618 = vmatpush3.bf16.msra.mxu0 %v1971_v5  ;;  %1523 = vmatprep.mubr.msk.f32.mxu0 %vm1849_vm0, %v1850_v1 }
 0x5c3   :  { %1619 = vmatprep.subr.bf16.mxu0 %v1848_v0 }
 0x5c6   :  { %1621 = vmatpush3.bf16.msra.mxu0 %v1987_v10 }
 0x5c7   :  { %1628 = vmatprep.subr.bf16.mxu0 %v1848_v0 }
 0x694   :  { %v522_v6 = vpop.f32.mrb[8].mxu0 }
 0x695   :  { %v523_v7 = vadd.f32 %v2008_v13, %v522_v6  ;;  %v1503_v8 = vpop.f32.mrb[9].mxu0 }
 0x697   :  { %534 = vrot.lane.b32.xlu0 %v523_v7, %s1851_s21  ;;  %v526_v11 = vadd.f32 %v523_v7, %v221_v9 }
 0x699   :  { %v1375_v12 = vmul.f32 -1.442695, %v526_v11 }
 0x69b   :  { %1682 = vpow2.f32 %v1375_v12 }
 0x6a5   :  { %v1683_v14 = vpop.eup %1682 }
 0x6a6   :  { %v530_v15 = vadd.f32 1.0, %v1683_v14 }
 0x6a8   :  { %1684 = vrcp.f32 %v530_v15 }
 0x6b2   :  { %v1685_v16 = vpop.eup %1684 }
 0x6b3   :  { %v544_v23 = vsub.f32 1.0, %v1685_v16  ;;  %v550_v25 = vmul.f32 %v1685_v16, %v450_v59 }
 0x709   :  { %v535_v18 = vpop.permute.xlu0 %534 }
 0x70a   :  { %v537_v19 = vmul.f32 %v1685_v16, %v535_v18  ;;  %v236_v18 = vadd.f32 %v2064_v62, %v2015_v17 }
 0x70c   :  { %539 = vrot.lane.b32.xlu1 %v537_v19, %s1851_s21 }
 0x77e   :  { %v540_v20 = vpop.permute.xlu1 %539 }
 0x77f   :  { %v542_v21 = vadd.f32 %v540_v20, %v221_v9 }
 0x781   :  { %1686 = vtanh.f32 %v542_v21 }
 0x78b   :  { %v1687_v22 = vpop.eup %1686 }
 0x78c   :  { %546 = vrot.lane.b32.xlu0 %v1687_v22, %s1852_s4 }
 0x7fe   :  { %v547_v24 = vpop.permute.xlu0 %546 }
 0x7ff   :  { %v549_v26 = vmul.f32 %v547_v24, %v544_v23 }
 0x801   :  { %v551_v27 = vadd.f32 %v550_v25, %v549_v26 }
 0x803   :  { %553 = vrot.lane.b32.xlu1 %v551_v27, %s1852_s4 }
 0x875   :  { %v554_v28 = vpop.permute.xlu1 %553 }
 0x876   :  { %1513 = vmatmul.mubr.msk.f32.vlgmr.msra.gmra.mrb[4].mxu1 %vm249_vm3, %v554_v28 }
 0x877   :  { %1624 = vmatpush3.bf16.msra.mxu1 %v1971_v5  ;;  %1534 = vmatprep.mubr.msk.f32.mxu1 %vm1849_vm0, %v1850_v1 }
 0x878   :  { %1625 = vmatprep.subr.bf16.mxu1 %v1848_v0 }
 0x87b   :  { %1627 = vmatpush3.bf16.msra.mxu1 %v1987_v10 }
 0x87c   :  { %1634 = vmatprep.subr.bf16.mxu1 %v1848_v0 }
 0x949   :  { %v623_v29 = vpop.f32.mrb[4].mxu1 }
 0x94a   :  { %v624_v30 = vadd.f32 %v2008_v13, %v623_v29  ;;  %v1514_v31 = vpop.f32.mrb[5].mxu1 }
 0x94c   :  { %635 = vrot.lane.b32.xlu0 %v624_v30, %s1851_s21  ;;  %v627_v34 = vadd.f32 %v624_v30, %v226_v32 }
 0x94e   :  { %v1377_v35 = vmul.f32 -1.442695, %v627_v34 }
 0x950   :  { %1688 = vpow2.f32 %v1377_v35 }
 0x95a   :  { %v1689_v36 = vpop.eup %1688 }
 0x95b   :  { %v631_v37 = vadd.f32 1.0, %v1689_v36  ;;  %v241_v36 = vadd.f32 %v2015_v17, %v2070_v3 }
 0x95d   :  { %1690 = vrcp.f32 %v631_v37 }
 0x967   :  { %v1691_v38 = vpop.eup %1690 }
 0x968   :  { %v645_v44 = vsub.f32 1.0, %v1691_v38  ;;  %v651_v46 = vmul.f32 %v1691_v38, %v551_v27 }
 0x9be   :  { %v636_v39 = vpop.permute.xlu0 %635 }
 0x9bf   :  { %v638_v40 = vmul.f32 %v1691_v38, %v636_v39 }
 0x9c1   :  { %640 = vrot.lane.b32.xlu1 %v638_v40, %s1851_s21 }
 0xa33   :  { %v641_v41 = vpop.permute.xlu1 %640 }
 0xa34   :  { %v643_v42 = vadd.f32 %v641_v41, %v226_v32 }
 0xa36   :  { %1692 = vtanh.f32 %v643_v42 }
 0xa40   :  { %v1693_v43 = vpop.eup %1692 }
 0xa41   :  { %647 = vrot.lane.b32.xlu0 %v1693_v43, %s1852_s4 }
 0xab3   :  { %v648_v45 = vpop.permute.xlu0 %647 }
 0xab4   :  { %v650_v47 = vmul.f32 %v648_v45, %v645_v44 }
 0xab6   :  { %v652_v48 = vadd.f32 %v651_v46, %v650_v47 }
 0xab8   :  { %654 = vrot.lane.b32.xlu1 %v652_v48, %s1852_s4 }
 0xb2a   :  { %v655_v49 = vpop.permute.xlu1 %654 }
 0xb2b   :  { %1524 = vmatmul.mubr.msk.f32.vlgmr.msra.gmra.mrb[10].mxu0 %vm249_vm3, %v655_v49 }
 0xb2c   :  { %1630 = vmatpush3.bf16.msra.mxu0 %v1971_v5  ;;  %1545 = vmatprep.mubr.msk.f32.mxu0 %vm1849_vm0, %v1850_v1 }
 0xb2d   :  { %1631 = vmatprep.subr.bf16.mxu0 %v1848_v0 }
 0xb30   :  { %1633 = vmatpush3.bf16.msra.mxu0 %v1987_v10 }
 0xb31   :  { %1640 = vmatprep.subr.bf16.mxu0 %v1848_v0 }
 0xbfe   :  { %v724_v50 = vpop.f32.mrb[10].mxu0 }
 0xbff   :  { %v725_v51 = vadd.f32 %v2008_v13, %v724_v50  ;;  %v1525_v52 = vpop.f32.mrb[11].mxu0 }
 0xc01   :  { %736 = vrot.lane.b32.xlu0 %v725_v51, %s1851_s21  ;;  %v728_v54 = vadd.f32 %v725_v51, %v231_v53 }
 0xc03   :  { %v1379_v55 = vmul.f32 -1.442695, %v728_v54 }
 0xc05   :  { %1694 = vpow2.f32 %v1379_v55  ;;  %v246_v55 = vadd.f32 %v2068_v2, %v2015_v17  ;;  %v1066_v2 = vld [vmem:[%s2205_s5 + $0x10] sm:$0xff] }
 0xc0f   :  { %v1695_v56 = vpop.eup %1694 }
 0xc10   :  { %v732_v57 = vadd.f32 1.0, %v1695_v56 }
 0xc12   :  { %1696 = vrcp.f32 %v732_v57 }
 0xc1c   :  { %v1697_v58 = vpop.eup %1696 }
 0xc1d   :  { %v746_v7 = vsub.f32 1.0, %v1697_v58  ;;  %v752_v63 = vmul.f32 %v1697_v58, %v652_v48 }
 0xc73   :  { %v737_v59 = vpop.permute.xlu0 %736 }
 0xc74   :  { %v739_v60 = vmul.f32 %v1697_v58, %v737_v59 }
 0xc76   :  { %741 = vrot.lane.b32.xlu1 %v739_v60, %s1851_s21 }
 0xce8   :  { %v742_v61 = vpop.permute.xlu1 %741 }
 0xce9   :  { %v744_v4 = vadd.f32 %v742_v61, %v231_v53 }
 0xceb   :  { %1698 = vtanh.f32 %v744_v4 }
 0xcf5   :  { %v1699_v6 = vpop.eup %1698 }
 0xcf6   :  { %748 = vrot.lane.b32.xlu0 %v1699_v6, %s1852_s4  ;;  %v1065_v6 = vld [vmem:[%s2205_s5 + $0x8] sm:$0xff] }
 0xd68   :  { %v749_v8 = vpop.permute.xlu0 %748 }
 0xd69   :  { %v751_v9 = vmul.f32 %v749_v8, %v746_v7  ;;  %v1067_v7 = vld [vmem:[%s2205_s5 + $0x18] sm:$0xff] }
 0xd6b   :  { %v753_v11 = vadd.f32 %v752_v63, %v751_v9  ;;  %v1644_v63 = vpack.c.bf16 %v1067_v7, %v1066_v2 }
 0xd6d   :  { %755 = vrot.lane.b32.xlu1 %v753_v11, %s1852_s4 }
 0xddf   :  { %v756_v12 = vpop.permute.xlu1 %755 }
 0xde0   :  { %1535 = vmatmul.mubr.msk.f32.vlgmr.msra.gmra.mrb[6].mxu1 %vm249_vm3, %v756_v12  ;;  %v1151_v12 = vld [vmem:[#allocation5 + $0x8] sm:$0xff] }
 0xde1   :  { %1636 = vmatpush3.bf16.msra.mxu1 %v1971_v5  ;;  %1556 = vmatprep.mubr.msk.f32.mxu1 %vm1849_vm0, %v1850_v1 }
 0xde2   :  { %1637 = vmatprep.subr.bf16.mxu1 %v1848_v0 }
 0xde5   :  { %1639 = vmatpush3.bf16.msra.mxu1 %v1987_v10 }
 0xde6   :  { %1646 = vmatprep.subr.bf16.mxu1 %v1848_v0 }
 0xeb3   :  { %v825_v14 = vpop.f32.mrb[6].mxu1 }
 0xeb4   :  { %v826_v15 = vadd.f32 %v2008_v13, %v825_v14  ;;  %v1536_v16 = vpop.f32.mrb[7].mxu1  ;;  %v1152_v14 = vld [vmem:[#allocation5 + $0x10] sm:$0xff] }
 0xeb5   :  { %v1153_v16 = vld [vmem:[#allocation5 + $0x18] sm:$0xff] }
 0xeb6   :  { %837 = vrot.lane.b32.xlu0 %v826_v15, %s1851_s21  ;;  %v829_v19 = vadd.f32 %v826_v15, %v236_v18 }
 0xeb8   :  { %v1381_v5 = vmul.f32 -1.442695, %v829_v19 }
 0xeba   :  { %1700 = vpow2.f32 %v1381_v5  ;;  %v349_v5 = vmax.f32 %v2020_v33, 0.0 }
 0xec4   :  { %v1701_v20 = vpop.eup %1700 }
 0xec5   :  { %v833_v21 = vadd.f32 1.0, %v1701_v20 }
 0xec7   :  { %1702 = vrcp.f32 %v833_v21 }
 0xed1   :  { %v1703_v22 = vpop.eup %1702 }
 0xed2   :  { %v847_v27 = vsub.f32 1.0, %v1703_v22  ;;  %v853_v62 = vmul.f32 %v1703_v22, %v753_v11  ;;  %v1150_v11 = vld [vmem:[#allocation5] sm:$0xff] }
 0xed3   :  { %v1647_v15 = vpack.c.bf16 %v1151_v12, %v1150_v11 }
 0xf28   :  { %v838_v23 = vpop.permute.xlu0 %837 }
 0xf29   :  { %v840_v10 = vmul.f32 %v1703_v22, %v838_v23 }
 0xf2b   :  { %842 = vrot.lane.b32.xlu1 %v840_v10, %s1851_s21 }
 0xf9d   :  { %v843_v24 = vpop.permute.xlu1 %842 }
 0xf9e   :  { %v845_v25 = vadd.f32 %v843_v24, %v236_v18  ;;  %v1650_v18 = vpack.c.bf16 %v1153_v16, %v1152_v14 }
 0xfa0   :  { %1704 = vtanh.f32 %v845_v25 }
 0xfaa   :  { %v1705_v26 = vpop.eup %1704 }
 0xfab   :  { %849 = vrot.lane.b32.xlu0 %v1705_v26, %s1852_s4 }
0x101d   :  { %v850_v28 = vpop.permute.xlu0 %849 }
0x101e   :  { %v852_v29 = vmul.f32 %v850_v28, %v847_v27  ;;  %v1386_v27 = vld [vmem:[#allocation8] ss:$0 sm:$0xff] }
0x1020   :  { %v854_v30 = vadd.f32 %v853_v62, %v852_v29 }
0x1022   :  { %856 = vrot.lane.b32.xlu1 %v854_v30, %s1852_s4 }
0x1094   :  { %v857_v31 = vpop.permute.xlu1 %856 }
0x1095   :  { %1546 = vmatmul.mubr.msk.f32.vlgmr.msra.gmra.mrb[12].mxu0 %vm249_vm3, %v857_v31 }
0x1096   :  { %1567 = vmatprep.mubr.msk.f32.mxu0 %vm1849_vm0, %v1850_v1 }
0x1168   :  { %v926_v32 = vpop.f32.mrb[12].mxu0 }
0x1169   :  { %v927_v34 = vadd.f32 %v2008_v13, %v926_v32  ;;  %v1547_v35 = vpop.f32.mrb[13].mxu0 }
0x116b   :  { %938 = vrot.lane.b32.xlu0 %v927_v34, %s1851_s21  ;;  %v930_v37 = vadd.f32 %v927_v34, %v241_v36 }
0x116d   :  { %v1383_v38 = vmul.f32 -1.442695, %v930_v37 }
0x116f   :  { %1706 = vpow2.f32 %v1383_v38 }
0x1179   :  { %v1707_v39 = vpop.eup %1706 }
0x117a   :  { %v934_v40 = vadd.f32 1.0, %v1707_v39 }
0x117c   :  { %1708 = vrcp.f32 %v934_v40 }
0x1186   :  { %v1709_v41 = vpop.eup %1708 }
0x1187   :  { %v948_v47 = vsub.f32 1.0, %v1709_v41  ;;  %v954_v3 = vmul.f32 %v1709_v41, %v854_v30  ;;  %v1387_v30 = vld [vmem:[#allocation7] ss:$0 sm:$0xff] }
0x11dd   :  { %v939_v42 = vpop.permute.xlu0 %938 }
0x11de   :  { %v941_v43 = vmul.f32 %v1709_v41, %v939_v42  ;;  %v1255_v41 = vld [vmem:[%s2209_s9] sm:$0xff]  ;;  %v1256_v42 = vld [vmem:[%s2209_s9 + $0x8] sm:$0xff] }
0x11e0   :  { %943 = vrot.lane.b32.xlu1 %v941_v43, %s1851_s21  ;;  %v1257_v43 = vld [vmem:[%s2209_s9 + $0x10] sm:$0xff] }
0x1252   :  { %v944_v44 = vpop.permute.xlu1 %943 }
0x1253   :  { %v946_v45 = vadd.f32 %v944_v44, %v241_v36  ;;  %v1653_v44 = vpack.c.bf16 %v1256_v42, %v1255_v41 }
0x1255   :  { %1710 = vtanh.f32 %v946_v45  ;;  %v1258_v45 = vld [vmem:[%s2209_s9 + $0x18] sm:$0xff] }
0x125f   :  { %v1711_v46 = vpop.eup %1710 }
0x1260   :  { %950 = vrot.lane.b32.xlu0 %v1711_v46, %s1852_s4  ;;  %v1656_v46 = vpack.c.bf16 %v1258_v45, %v1257_v43 }
0x12d2   :  { %v951_v48 = vpop.permute.xlu0 %950 }
0x12d3   :  { %v953_v49 = vmul.f32 %v951_v48, %v948_v47 }
0x12d5   :  { %v955_v50 = vadd.f32 %v954_v3, %v953_v49 }
0x12d7   :  { %957 = vrot.lane.b32.xlu1 %v955_v50, %s1852_s4 }
0x1349   :  { %v958_v51 = vpop.permute.xlu1 %957 }
0x134a   :  { %1557 = vmatmul.mubr.msk.f32.vlgmr.msra.gmra.mrb[8].mxu1 %vm249_vm3, %v958_v51 }
0x134b   :  { %1578 = vmatprep.mubr.msk.f32.mxu1 %vm1849_vm0, %v1850_v1  ;;  %1648 = vmatpush3.bf16.msra.mxu1 %v1647_v15 }
0x134c   :  { %1649 = vmatprep.subr.bf16.mxu1 %v1848_v0 }
0x134f   :  { %1651 = vmatpush3.bf16.msra.mxu1 %v1650_v18 }
0x141d   :  { %v1027_v52 = vpop.f32.mrb[8].mxu1 }
0x141e   :  { %v1028_v53 = vadd.f32 %v2008_v13, %v1027_v52  ;;  %v1558_v54 = vpop.f32.mrb[9].mxu1  ;;  %v1064_v13 = vld [vmem:[%s2205_s5] sm:$0xff] }
0x141f   :  { %v1641_v17 = vpack.c.bf16 %v1065_v6, %v1064_v13 }
0x1420   :  { %1039 = vrot.lane.b32.xlu0 %v1028_v53, %s1851_s21  ;;  %v1031_v56 = vadd.f32 %v1028_v53, %v246_v55  ;;  %v1391_v53 = vld [vmem:[%s2210_s10] ss:$0 sm:$0xff] }
0x1421   :  { %1642 = vmatpush3.bf16.msra.mxu0 %v1641_v17 }
0x1422   :  { %v1385_v57 = vmul.f32 -1.442695, %v1031_v56  ;;  %1643 = vmatprep.subr.bf16.mxu0 %v1848_v0 }
0x1424   :  { %1712 = vpow2.f32 %v1385_v57 }
0x1425   :  { %1645 = vmatpush3.bf16.msra.mxu0 %v1644_v63 }
0x1426   :  { %1652 = vmatprep.subr.bf16.mxu0 %v1848_v0 }
0x142e   :  { %v1713_v58 = vpop.eup %1712 }
0x142f   :  { %v1035_v59 = vadd.f32 1.0, %v1713_v58 }
0x1431   :  { %1714 = vrcp.f32 %v1035_v59 }
0x143b   :  { %v1715_v60 = vpop.eup %1714 }
0x143c   :  { %v1049_v20 = vsub.f32 1.0, %v1715_v60  ;;  %v1055_v22 = vmul.f32 %v1715_v60, %v955_v50 }
0x1492   :  { %v1040_v61 = vpop.permute.xlu0 %1039 }
0x1493   :  { %v1042_v4 = vmul.f32 %v1715_v60, %v1040_v61 }
0x1495   :  { %1044 = vrot.lane.b32.xlu1 %v1042_v4, %s1851_s21 }
0x1507   :  { %v1045_v8 = vpop.permute.xlu1 %1044 }
0x1508   :  { %v1047_v9 = vadd.f32 %v1045_v8, %v246_v55 }
0x150a   :  { %1716 = vtanh.f32 %v1047_v9 }
0x1514   :  { %v1717_v19 = vpop.eup %1716 }
0x1515   :  { %1051 = vrot.lane.b32.xlu0 %v1717_v19, %s1852_s4 }
0x1519   :  { %1076 = vrot.lane.b32.xlu0 %v349_v5, %s1852_s4 }
0x1587   :  { %v1052_v21 = vpop.permute.xlu0 %1051 }
0x1588   :  { %v1054_v23 = vmul.f32 %v1052_v21, %v1049_v20 }
0x158a   :  { %v1056_v10 = vadd.f32 %v1055_v22, %v1054_v23 }
0x158b   :  { %v1077_v24 = vpop.permute.xlu0 %1076 }
0x158c   :  { %1155 = vrot.lane.b32.xlu1 %v1056_v10, %s1852_s4  ;;  %1568 = vmatmul.mubr.msk.f32.vlgmr.msra.gmra.mrb[14].mxu0 %vm249_vm3, %v1077_v24 }
0x158d   :  { %1589 = vmatprep.mubr.msk.f32.mxu0 %vm1849_vm0, %v1850_v1  ;;  %1654 = vmatpush3.bf16.msra.mxu0 %v1653_v44 }
0x158e   :  { %1655 = vmatprep.subr.bf16.mxu0 %v1848_v0 }
0x1591   :  { %1657 = vmatpush3.bf16.msra.mxu0 %v1656_v46 }
0x15fe   :  { %v1156_v25 = vpop.permute.xlu1 %1155 }
0x15ff   :  { %1579 = vmatmul.mubr.msk.f32.vlgmr.msra.gmra.mrb[10].mxu1 %vm249_vm3, %v1156_v25 }
0x165f   :  { %v1146_v26 = vpop.f32.mrb[14].mxu0 }
0x1660   :  { %v1569_v33 = vpop.f32.mrb[15].mxu0  ;;  %v1147_v31 = vadd.f32 %v1387_v30, %v1146_v26 }
0x16d2   :  { %v1225_v28 = vpop.f32.mrb[10].mxu1 }
0x16d3   :  { %v1226_v62 = vadd.f32 %v1386_v27, %v1225_v28  ;;  %v1580_v29 = vpop.f32.mrb[11].mxu1 }
0x16d5   :  { %1237 = vrot.lane.b32.xlu1 %v1226_v62, %s1851_s21  ;;  %v1229_v32 = vadd.f32 %v1226_v62, %v1147_v31 }
0x16d7   :  { %v1390_v34 = vmul.f32 -1.442695, %v1229_v32 }
0x16d9   :  { %1718 = vpow2.f32 %v1390_v34 }
0x16e3   :  { %v1719_v35 = vpop.eup %1718 }
0x16e4   :  { %v1233_v36 = vadd.f32 1.0, %v1719_v35 }
0x16e6   :  { %1720 = vrcp.f32 %v1233_v36 }
0x16f0   :  { %v1721_v1 = vpop.eup %1720 }
0x16f1   :  { %v1247_v48 = vsub.f32 1.0, %v1721_v1  ;;  %v1253_v49 = vmul.f32 %v1721_v1, %v1056_v10 }
0x1747   :  { %v1238_v37 = vpop.permute.xlu1 %1237 }
0x1748   :  { %v1240_v38 = vmul.f32 %v1721_v1, %v1238_v37 }
0x174a   :  { %1242 = vrot.lane.b32.xlu0 %v1240_v38, %s1851_s21 }
0x17bc   :  { %v1243_v39 = vpop.permute.xlu0 %1242 }
0x17bd   :  { %v1245_v40 = vadd.f32 %v1243_v39, %v1147_v31 }
0x17bf   :  { %1722 = vtanh.f32 %v1245_v40 }
0x17c9   :  { %v1723_v47 = vpop.eup %1722 }
0x17ca   :  { %1249 = vrot.lane.b32.xlu1 %v1723_v47, %s1852_s4 }
0x183c   :  { %v1250_v3 = vpop.permute.xlu1 %1249 }
0x183d   :  { %v1252_v50 = vmul.f32 %v1250_v3, %v1247_v48 }
0x183f   :  { %v1254_v51 = vadd.f32 %v1253_v49, %v1252_v50 }
0x1841   :  { %1267 = vrot.lane.b32.xlu0 %v1254_v51, %s1852_s4 }
0x18b3   :  { %v1268_v52 = vpop.permute.xlu0 %1267 }
0x18b4   :  { %1590 = vmatmul.mubr.msk.f32.vlgmr.msra.gmra.mrb[16].mxu0 %vm249_vm3, %v1268_v52 }
0x1987   :  { %v1337_v54 = vpop.f32.mrb[16].mxu0 }
0x1988   :  { %v1338_v0 = vadd.f32 %v1391_v53, %v1337_v54  ;;  %v1591_v55 = vpop.f32.mrb[17].mxu0 }
0x198a   :  { %v1341_v56 = vmax.f32 %v1338_v0, 0.0 }
0x198c   :  { %1342 = vst [vmem:[#allocation10] sm:$0xff] %v1341_v56 }
0x198d   :  { %1823 = shalt.err (!%p1820_p8)
}
0x198e   :  { %s1824_s15 = scalar_lea.hbm %s2211_s11, 128 }
0x198f   :  { %p1825_p9 = scmp.ne.s32.totalorder %s2211_s11, %s1824_s15  ;;  %p1828_p10 = scmp.lt.u32.totalorder %s1824_s15, %s2211_s11 }
0x1991   :  { %p1830_p11 = pnand %p1828_p10, %p1825_p9 }
0x1993   :  { %1833 = shalt.err (!%p1830_p11)
}
0x1994   :  { %1352 = dma.vmem_to_hbm [thread:$0]  %s1350_s24, 128, %s2211_s11, [#allocation4]  }
0x1995   :  { %1840 = dma.done.wait [#allocation4], 128  }
0x1996   :  { %1841 = vsyncadd [#allocation4], 4294967168 }
0x1997   :  { %1356 = vsyncpa [#allocation3], 1 }
0x1998   :  { %1357 = vsyncpa [#allocation6], 1 }
0x1999   :  { %1358 = vsyncpa [#allocation9], 1 }
0x199a   :  { %1359 = vsyncpa [#allocation4], 1 }

</bundles_post_ra>
